<compile_context>
chip_gen: v7x
topology: tpu7x:2x2x1
jax: 0.10.0
libtpu: 0.0.40
codegen_flags: <defaults>
</compile_context>

<pallas_src>
import jax
import jax.numpy as jnp
from jax import lax
from jax.experimental import pallas as pl
from jax.experimental.pallas import tpu as pltpu

INPUT_SIZE = 2          # "separate" (exc/inh) model variant
LAYER_SIZE = 10
PADDED_SIZE = 16        # LAYER_SIZE rounded up to the sublane tile (vreg-aligned)
NUM_LAYERS = 5
NUM_HIDDEN_BLOCKS = NUM_LAYERS - 1   # LayerNorm + Linear + ReLU blocks
LN_EPS = 1e-5
MAX_TILE_N = 4096       # lanes per grid step (step-count sized, v5e-VMEM safe)

assert LAYER_SIZE <= PADDED_SIZE


def _leaky_tanh(x):
    # TODO(synk): exact LeakyTanh definition is not in the provided source;
    # using tanh(x) + 0.01 * x as a leaky saturating activation.
    return jnp.tanh(x) + 0.01 * x


def dnn_neuron_kernel(x_ref, w0_ref, b0_ref, ws_ref, bh_ref, rs_ref,
                      wl_ref, bl_ref, o_ref):
    """One lane-tile of the DNN-neuron forward.

    x_ref : (C, T)  f32         streamed input tile (T lanes of flattened batch)
    w0_ref: (LP, C) bf16        input Linear (rows >= LAYER_SIZE are zero)
    b0_ref: (LP, 1) f32
    ws_ref: (H, LP+2, 2LP) bf16 per-block stacked LHS: [W' ; mu-row ; m2-row]
    bh_ref: (H, LP, 1) f32      folded bias  (beta @ W + b)
    rs_ref: (H, LP, 1) f32      row-sums of W'  (= W' @ 1)
    wl_ref: (1, LP) bf16        output Linear
    bl_ref: (1, 1)  f32
    o_ref : (1, T)  f32         lane-dense output tile
    """
    LP = PADDED_SIZE
    x = x_ref[...]                                              # (C, T) f32

    # Residual = sum over the C input channels: explicit row adds (pure VALU,
    # no cross-sublane reduce through the XLU/extended slot).
    res = x[0:1, :]
    for c in range(1, INPUT_SIZE):
        res = res + x[c:c + 1, :]

    # Input Linear on the MXU (bf16 operands, f32 accumulation).
    h = jnp.dot(w0_ref[...], x.astype(jnp.bfloat16),
                preferred_element_type=jnp.float32) + b0_ref[...]   # (LP, T)

    # Hidden blocks: LayerNorm + Linear + ReLU fused into ONE matmul per block.
    #   RHS = [h ; h*h]                    (2*LP, T)  (vreg-aligned concat)
    #   LHS = [W'_i ; 1/L-row ; 1/L-row]   (LP+2, 2*LP)
    #   -> rows 0..LP-1 = G = W'_i @ h, row LP = mu, row LP+1 = E[h^2]
    # and  W'_i @ ((h - mu) * inv_std) == inv_std * (G - mu * rowsum(W'_i)),
    # so the normalized activation `hn` is never materialized.
    for i in range(NUM_HIDDEN_BLOCKS):
        hb = h.astype(jnp.bfloat16)
        rhs = jnp.concatenate([hb, hb * hb], axis=0)                 # (2*LP, T)
        r = jnp.dot(ws_ref[i], rhs,
                    preferred_element_type=jnp.float32)              # (LP+2, T)
        g = r[0:LP, :]
        mu = r[LP:LP + 1, :]
        m2 = r[LP + 1:LP + 2, :]
        inv_std = lax.rsqrt(jnp.maximum(m2 - mu * mu, 0.0) + LN_EPS)
        h = jnp.maximum(inv_std * (g - mu * rs_ref[i]) + bh_ref[i], 0.0)

    # Output Linear -> (1, T), residual, final activation; lane-dense store.
    out = jnp.dot(wl_ref[...], h.astype(jnp.bfloat16),
                  preferred_element_type=jnp.float32) + bl_ref[...]
    o_ref[...] = _leaky_tanh(out + res)


# ----------------------------------------------------------------------------
# Wrapper helpers
# ----------------------------------------------------------------------------
def _round_up(x, m):
    return ((x + m - 1) // m) * m


def _choose_grid(n):
    """Pick (tile_n, num_steps).

    - tile capped at MAX_TILE_N=4096: per-step compute dwarfs the ~0.35us grid
      overhead while staying far under v5e's 16 MiB scoped-VMEM default.
    - step count rounded up to a multiple of 2 whenever N allows, so v7x's two
      TensorCores get a balanced, pipelinable "parallel" grid.
    - padding waste is < 128 columns per step; the ragged tail is a partial
      last block handled by Pallas masking (no jnp.pad wrapper pass).
    """
    steps = max(1, pl.cdiv(n, MAX_TILE_N))
    if n >= 256:
        steps = _round_up(max(steps, 2), 2)
    tile = _round_up(pl.cdiv(n, steps), 128)
    steps = max(1, pl.cdiv(n, tile))
    return tile, steps


def _pack_params(params):
    """Fold the LayerNorm affine and the normalization into the per-block Linear
    and build one stacked matmul LHS per hidden block (see kernel docstring).
    Matmul operands are stored in bf16 (the stationary side is tiny/constant)."""
    L, LP, H, C = LAYER_SIZE, PADDED_SIZE, NUM_HIDDEN_BLOCKS, INPUT_SIZE
    gamma, beta = params["gamma"], params["beta"]          # (H, L)
    wh, bh = params["wh"], params["bh"]                    # (H, L_in, L_out), (H, L_out)

    # LN affine folded into the following Linear (exact):
    #   (hn*gamma + beta) @ W + b == hn @ (diag(gamma) @ W) + (beta @ W + b)
    w_blk = jnp.transpose(wh, (0, 2, 1)) * gamma[:, None, :]          # (H, out, in)
    b_blk = jnp.einsum("hi,hio->ho", beta, wh) + bh                   # (H, out)
    w_rowsum = jnp.sum(w_blk, axis=-1)                                # (H, out) = W' @ 1

    inv_l = 1.0 / L
    ws = jnp.zeros((H, LP + 2, 2 * LP), jnp.float32)
    ws = ws.at[:, :L, :L].set(w_blk)
    ws = ws.at[:, LP, :L].set(inv_l)               # mu row   (over the h half)
    ws = ws.at[:, LP + 1, LP:LP + L].set(inv_l)    # E[h^2] row (over the h*h half)

    bh_p = jnp.zeros((H, LP, 1), jnp.float32).at[:, :L, 0].set(b_blk)
    rs_p = jnp.zeros((H, LP, 1), jnp.float32).at[:, :L, 0].set(w_rowsum)

    w0_p = jnp.zeros((LP, C), jnp.float32).at[:L, :].set(params["w0"].T)
    b0_p = jnp.zeros((LP, 1), jnp.float32).at[:L, 0].set(params["b0"].reshape(-1))
    wl_p = jnp.zeros((1, LP), jnp.float32).at[0, :L].set(params["wl"].reshape(-1))
    bl_p = params["bl"].reshape(1, 1).astype(jnp.float32)

    return dict(
        w0=w0_p.astype(jnp.bfloat16), b0=b0_p,
        ws=ws.astype(jnp.bfloat16), bh=bh_p, rs=rs_p,
        wl=wl_p.astype(jnp.bfloat16), bl=bl_p,
    )


def _const_spec(shape):
    """Full-array block, identical for every grid step (no re-DMA per step)."""
    nd = len(shape)
    return pl.BlockSpec(shape, lambda i, _z=(0,) * nd: _z)


def dnn_neuron_forward_cn(x_cn, packed):
    """Forward on a channels-first (C, N) input with pre-packed params.
    Use this entry when the (C, N) layout is available upstream: it avoids the
    wrapper transpose HBM pass entirely.  Returns the (1, N) f32 output."""
    C, N = x_cn.shape
    assert C == INPUT_SIZE
    tile_n, steps = _choose_grid(N)

    in_specs = [
        pl.BlockSpec((C, tile_n), lambda i: (0, i)),     # streamed input tile
        _const_spec(packed["w0"].shape),
        _const_spec(packed["b0"].shape),
        _const_spec(packed["ws"].shape),
        _const_spec(packed["bh"].shape),
        _const_spec(packed["rs"].shape),
        _const_spec(packed["wl"].shape),
        _const_spec(packed["bl"].shape),
    ]
    out_spec = pl.BlockSpec((1, tile_n), lambda i: (0, i))

    return pl.pallas_call(
        dnn_neuron_kernel,
        out_shape=jax.ShapeDtypeStruct((1, N), jnp.float32),
        grid=(steps,),
        in_specs=in_specs,
        out_specs=out_spec,
        compiler_params=pltpu.CompilerParams(
            dimension_semantics=("parallel",)),
    )(x_cn, packed["w0"], packed["b0"], packed["ws"], packed["bh"],
      packed["rs"], packed["wl"], packed["bl"])


def dnn_neuron_forward(hidden, params):
    """Module-parity entry: hidden is (N, C) like the torch module.
    Returns (out [N, 1], empty hidden-state tuple).  The single transpose to the
    lane-dense (C, N) layout is the only wrapper-side HBM pass; callers that can
    produce (C, N) upstream should use dnn_neuron_forward_cn directly."""
    N, C = hidden.shape
    assert C == INPUT_SIZE
    packed = _pack_params(params)
    out = dnn_neuron_forward_cn(jnp.transpose(hidden), packed)
    out = out[0, :].reshape(N, 1)
    return out, (jnp.zeros((0,), jnp.float32),)   # mirrors (out, tuple(torch.zeros(0)))


# ----------------------------------------------------------------------------
# Pure-JAX reference (same math as the torch module: un-folded LN affine,
# two-pass variance) — validates the kernel's algebraic rewrites.
# ----------------------------------------------------------------------------
def reference_forward(hidden, p):
    h = hidden @ p["w0"] + p["b0"]
    for i in range(NUM_HIDDEN_BLOCKS):
        mu = h.mean(-1, keepdims=True)
        var = ((h - mu) ** 2).mean(-1, keepdims=True)
        hn = (h - mu) / jnp.sqrt(var + LN_EPS) * p["gamma"][i] + p["beta"][i]
        h = jnp.maximum(hn @ p["wh"][i] + p["bh"][i], 0.0)
    out = h @ p["wl"] + p["bl"]
    out = out + hidden.sum(-1, keepdims=True)
    return _leaky_tanh(out)


def init_params(key):
    """Deterministic PyTorch-style init (uniform +-1/sqrt(fan_in); LN gamma=1, beta=0)."""
    ks = jax.random.split(key, 6)
    L, C, H = LAYER_SIZE, INPUT_SIZE, NUM_HIDDEN_BLOCKS
    bnd_in = 1.0 / jnp.sqrt(C)
    bnd_h = 1.0 / jnp.sqrt(L)
    u = lambda k, shape, b: jax.random.uniform(k, shape, jnp.float32, -b, b)
    return {
        "w0": u(ks[0], (C, L), bnd_in),
        "b0": u(ks[1], (1, L), bnd_in),
        "gamma": jnp.ones((H, L), jnp.float32),
        "beta": jnp.zeros((H, L), jnp.float32),
        "wh": u(ks[2], (H, L, L), bnd_h),
        "bh": u(ks[3], (H, L), bnd_h),
        "wl": u(ks[4], (L, 1), bnd_h),
        "bl": u(ks[5], (1, 1), bnd_h),
    }


if __name__ == "__main__":
    key = jax.random.PRNGKey(0)
    k_param, k_x = jax.random.split(key)
    params = init_params(k_param)

    # Lane-aligned case (grid of 2 steps x 128 lanes).
    N = 256
    hidden = jax.random.normal(k_x, (N, INPUT_SIZE), jnp.float32)
    out, hidden_states = dnn_neuron_forward(hidden, params)
    out = jax.block_until_ready(out)
    ref = reference_forward(hidden, params)
    assert out.shape == (N, 1)
    err = float(jnp.max(jnp.abs(out - ref)))
    # bf16 matmul operands (f32 accumulation): tolerance loosened from 1e-4.
    assert err < 3e-2, err

    # Ragged case: exercises the partial last block (no jnp.pad in the wrapper).
    N2 = 300
    hidden2 = jax.random.normal(jax.random.PRNGKey(1), (N2, INPUT_SIZE), jnp.float32)
    out2, _ = dnn_neuron_forward(hidden2, params)
    out2 = jax.block_until_ready(out2)
    ref2 = reference_forward(hidden2, params)
    assert out2.shape == (N2, 1)
    err2 = float(jnp.max(jnp.abs(out2 - ref2)))
    assert err2 < 3e-2, err2

    print("KERNEL_OK")
</pallas_src>

<mosaic_0001>
module attributes {stable_mosaic.version = 11 : i64} {
  func.func @dnn_neuron_kernel(%arg0: i32, %arg1: memref<2x128xf32, #tpu.memory_space<vmem>>, %arg2: memref<16x2xbf16, #tpu.memory_space<vmem>>, %arg3: memref<16x1xf32, #tpu.memory_space<vmem>>, %arg4: memref<4x18x32xbf16, #tpu.memory_space<vmem>>, %arg5: memref<4x16x1xf32, #tpu.memory_space<vmem>>, %arg6: memref<4x16x1xf32, #tpu.memory_space<vmem>>, %arg7: memref<1x16xbf16, #tpu.memory_space<vmem>>, %arg8: memref<1x1xf32, #tpu.memory_space<vmem>>, %arg9: memref<1x128xf32, #tpu.memory_space<vmem>>) attributes {dimension_semantics = [#tpu.dimension_semantics<parallel>], iteration_bounds = array<i64: 2>, scalar_prefetch = 0 : i64, scratch_operands = 0 : i64, tpu.core_type = #tpu.core_type<tc>, window_params = [{transform_indices = @transform_0, window_bounds = array<i64: 2, 128>}, {pipeline_mode = #tpu.pipeline_mode<synchronous>, transform_indices = @transform_1, window_bounds = array<i64: 16, 2>}, {pipeline_mode = #tpu.pipeline_mode<synchronous>, transform_indices = @transform_2, window_bounds = array<i64: 16, 1>}, {pipeline_mode = #tpu.pipeline_mode<synchronous>, transform_indices = @transform_3, window_bounds = array<i64: 4, 18, 32>}, {pipeline_mode = #tpu.pipeline_mode<synchronous>, transform_indices = @transform_4, window_bounds = array<i64: 4, 16, 1>}, {pipeline_mode = #tpu.pipeline_mode<synchronous>, transform_indices = @transform_5, window_bounds = array<i64: 4, 16, 1>}, {pipeline_mode = #tpu.pipeline_mode<synchronous>, transform_indices = @transform_6, window_bounds = array<i64: 1, 16>}, {pipeline_mode = #tpu.pipeline_mode<synchronous>, transform_indices = @transform_7, window_bounds = array<i64: 1, 1>}, {transform_indices = @transform_8, window_bounds = array<i64: 1, 128>}]} {
    %c0 = arith.constant 0 : index
    %c0_0 = arith.constant 0 : index
    %0 = vector.load %arg1[%c0, %c0_0] : memref<2x128xf32, #tpu.memory_space<vmem>>, vector<2x128xf32>
    %1 = vector.extract_strided_slice %0 {offsets = [0, 0], sizes = [1, 128], strides = [1, 1]} : vector<2x128xf32> to vector<1x128xf32>
    %2 = vector.extract_strided_slice %0 {offsets = [1, 0], sizes = [1, 128], strides = [1, 1]} : vector<2x128xf32> to vector<1x128xf32>
    %3 = arith.addf %1, %2 : vector<1x128xf32>
    %c0_1 = arith.constant 0 : index
    %c0_2 = arith.constant 0 : index
    %4 = vector.load %arg2[%c0_1, %c0_2] : memref<16x2xbf16, #tpu.memory_space<vmem>>, vector<16x2xbf16>
    %5 = arith.truncf %0 : vector<2x128xf32> to vector<2x128xbf16>
    %cst = arith.constant dense<0.000000e+00> : vector<16x128xf32>
    %6 = tpu.matmul %4, %5, %cst {dimension_numbers = #tpu.dot_dimension_numbers<[1], [0], [0], [1], [0, 0, 1, 1], [], []>} : vector<16x2xbf16>, vector<2x128xbf16>, vector<16x128xf32> -> vector<16x128xf32>
    %c0_3 = arith.constant 0 : index
    %c0_4 = arith.constant 0 : index
    %7 = vector.load %arg3[%c0_3, %c0_4] : memref<16x1xf32, #tpu.memory_space<vmem>>, vector<16x1xf32>
    %8 = vector.broadcast %7 : vector<16x1xf32> to vector<16x128xf32>
    %9 = arith.addf %6, %8 : vector<16x128xf32>
    %10 = arith.truncf %9 : vector<16x128xf32> to vector<16x128xbf16>
    %11 = arith.mulf %10, %10 : vector<16x128xbf16>
    %12 = tpu.concatenate %10, %11 in 0 : vector<16x128xbf16>, vector<16x128xbf16> -> vector<32x128xbf16>
    %c0_5 = arith.constant 0 : index
    %c0_6 = arith.constant 0 : index
    %c0_7 = arith.constant 0 : index
    %13 = vector.load %arg4[%c0_5, %c0_6, %c0_7] : memref<4x18x32xbf16, #tpu.memory_space<vmem>>, vector<1x18x32xbf16>
    %14 = vector.shape_cast %13 : vector<1x18x32xbf16> to vector<18x32xbf16>
    %cst_8 = arith.constant dense<0.000000e+00> : vector<18x128xf32>
    %15 = tpu.matmul %14, %12, %cst_8 {dimension_numbers = #tpu.dot_dimension_numbers<[1], [0], [0], [1], [0, 0, 1, 1], [], []>} : vector<18x32xbf16>, vector<32x128xbf16>, vector<18x128xf32> -> vector<18x128xf32>
    %16 = vector.extract_strided_slice %15 {offsets = [0, 0], sizes = [16, 128], strides = [1, 1]} : vector<18x128xf32> to vector<16x128xf32>
    %17 = vector.extract_strided_slice %15 {offsets = [16, 0], sizes = [1, 128], strides = [1, 1]} : vector<18x128xf32> to vector<1x128xf32>
    %18 = vector.extract_strided_slice %15 {offsets = [17, 0], sizes = [1, 128], strides = [1, 1]} : vector<18x128xf32> to vector<1x128xf32>
    %19 = arith.mulf %17, %17 : vector<1x128xf32>
    %20 = arith.subf %18, %19 : vector<1x128xf32>
    %cst_9 = arith.constant 0.000000e+00 : f32
    %21 = vector.broadcast %cst_9 : f32 to vector<1x128xf32>
    %22 = arith.maximumf %20, %21 : vector<1x128xf32>
    %cst_10 = arith.constant 9.99999974E-6 : f32
    %23 = vector.broadcast %cst_10 : f32 to vector<1x128xf32>
    %24 = arith.addf %22, %23 : vector<1x128xf32>
    %25 = math.rsqrt %24 : vector<1x128xf32>
    %c0_11 = arith.constant 0 : index
    %c0_12 = arith.constant 0 : index
    %c0_13 = arith.constant 0 : index
    %26 = vector.load %arg6[%c0_11, %c0_12, %c0_13] : memref<4x16x1xf32, #tpu.memory_space<vmem>>, vector<1x16x1xf32>
    %27 = vector.shape_cast %26 : vector<1x16x1xf32> to vector<16x1xf32>
    %28 = vector.broadcast %17 : vector<1x128xf32> to vector<16x128xf32>
    %29 = vector.broadcast %27 : vector<16x1xf32> to vector<16x128xf32>
    %30 = arith.mulf %28, %29 : vector<16x128xf32>
    %31 = arith.subf %16, %30 : vector<16x128xf32>
    %32 = vector.broadcast %25 : vector<1x128xf32> to vector<16x128xf32>
    %33 = arith.mulf %32, %31 : vector<16x128xf32>
    %c0_14 = arith.constant 0 : index
    %c0_15 = arith.constant 0 : index
    %c0_16 = arith.constant 0 : index
    %34 = vector.load %arg5[%c0_14, %c0_15, %c0_16] : memref<4x16x1xf32, #tpu.memory_space<vmem>>, vector<1x16x1xf32>
    %35 = vector.shape_cast %34 : vector<1x16x1xf32> to vector<16x1xf32>
    %36 = vector.broadcast %35 : vector<16x1xf32> to vector<16x128xf32>
    %37 = arith.addf %33, %36 : vector<16x128xf32>
    %cst_17 = arith.constant 0.000000e+00 : f32
    %38 = vector.broadcast %cst_17 : f32 to vector<16x128xf32>
    %39 = arith.maximumf %37, %38 : vector<16x128xf32>
    %40 = arith.truncf %39 : vector<16x128xf32> to vector<16x128xbf16>
    %41 = arith.mulf %40, %40 : vector<16x128xbf16>
    %42 = tpu.concatenate %40, %41 in 0 : vector<16x128xbf16>, vector<16x128xbf16> -> vector<32x128xbf16>
    %c1 = arith.constant 1 : index
    %c0_18 = arith.constant 0 : index
    %c0_19 = arith.constant 0 : index
    %43 = vector.load %arg4[%c1, %c0_18, %c0_19] : memref<4x18x32xbf16, #tpu.memory_space<vmem>>, vector<1x18x32xbf16>
    %44 = vector.shape_cast %43 : vector<1x18x32xbf16> to vector<18x32xbf16>
    %cst_20 = arith.constant dense<0.000000e+00> : vector<18x128xf32>
    %45 = tpu.matmul %44, %42, %cst_20 {dimension_numbers = #tpu.dot_dimension_numbers<[1], [0], [0], [1], [0, 0, 1, 1], [], []>} : vector<18x32xbf16>, vector<32x128xbf16>, vector<18x128xf32> -> vector<18x128xf32>
    %46 = vector.extract_strided_slice %45 {offsets = [0, 0], sizes = [16, 128], strides = [1, 1]} : vector<18x128xf32> to vector<16x128xf32>
    %47 = vector.extract_strided_slice %45 {offsets = [16, 0], sizes = [1, 128], strides = [1, 1]} : vector<18x128xf32> to vector<1x128xf32>
    %48 = vector.extract_strided_slice %45 {offsets = [17, 0], sizes = [1, 128], strides = [1, 1]} : vector<18x128xf32> to vector<1x128xf32>
    %49 = arith.mulf %47, %47 : vector<1x128xf32>
    %50 = arith.subf %48, %49 : vector<1x128xf32>
    %cst_21 = arith.constant 0.000000e+00 : f32
    %51 = vector.broadcast %cst_21 : f32 to vector<1x128xf32>
    %52 = arith.maximumf %50, %51 : vector<1x128xf32>
    %cst_22 = arith.constant 9.99999974E-6 : f32
    %53 = vector.broadcast %cst_22 : f32 to vector<1x128xf32>
    %54 = arith.addf %52, %53 : vector<1x128xf32>
    %55 = math.rsqrt %54 : vector<1x128xf32>
    %c1_23 = arith.constant 1 : index
    %c0_24 = arith.constant 0 : index
    %c0_25 = arith.constant 0 : index
    %56 = vector.load %arg6[%c1_23, %c0_24, %c0_25] : memref<4x16x1xf32, #tpu.memory_space<vmem>>, vector<1x16x1xf32>
    %57 = vector.shape_cast %56 : vector<1x16x1xf32> to vector<16x1xf32>
    %58 = vector.broadcast %47 : vector<1x128xf32> to vector<16x128xf32>
    %59 = vector.broadcast %57 : vector<16x1xf32> to vector<16x128xf32>
    %60 = arith.mulf %58, %59 : vector<16x128xf32>
    %61 = arith.subf %46, %60 : vector<16x128xf32>
    %62 = vector.broadcast %55 : vector<1x128xf32> to vector<16x128xf32>
    %63 = arith.mulf %62, %61 : vector<16x128xf32>
    %c1_26 = arith.constant 1 : index
    %c0_27 = arith.constant 0 : index
    %c0_28 = arith.constant 0 : index
    %64 = vector.load %arg5[%c1_26, %c0_27, %c0_28] : memref<4x16x1xf32, #tpu.memory_space<vmem>>, vector<1x16x1xf32>
    %65 = vector.shape_cast %64 : vector<1x16x1xf32> to vector<16x1xf32>
    %66 = vector.broadcast %65 : vector<16x1xf32> to vector<16x128xf32>
    %67 = arith.addf %63, %66 : vector<16x128xf32>
    %cst_29 = arith.constant 0.000000e+00 : f32
    %68 = vector.broadcast %cst_29 : f32 to vector<16x128xf32>
    %69 = arith.maximumf %67, %68 : vector<16x128xf32>
    %70 = arith.truncf %69 : vector<16x128xf32> to vector<16x128xbf16>
    %71 = arith.mulf %70, %70 : vector<16x128xbf16>
    %72 = tpu.concatenate %70, %71 in 0 : vector<16x128xbf16>, vector<16x128xbf16> -> vector<32x128xbf16>
    %c2 = arith.constant 2 : index
    %c0_30 = arith.constant 0 : index
    %c0_31 = arith.constant 0 : index
    %73 = vector.load %arg4[%c2, %c0_30, %c0_31] : memref<4x18x32xbf16, #tpu.memory_space<vmem>>, vector<1x18x32xbf16>
    %74 = vector.shape_cast %73 : vector<1x18x32xbf16> to vector<18x32xbf16>
    %cst_32 = arith.constant dense<0.000000e+00> : vector<18x128xf32>
    %75 = tpu.matmul %74, %72, %cst_32 {dimension_numbers = #tpu.dot_dimension_numbers<[1], [0], [0], [1], [0, 0, 1, 1], [], []>} : vector<18x32xbf16>, vector<32x128xbf16>, vector<18x128xf32> -> vector<18x128xf32>
    %76 = vector.extract_strided_slice %75 {offsets = [0, 0], sizes = [16, 128], strides = [1, 1]} : vector<18x128xf32> to vector<16x128xf32>
    %77 = vector.extract_strided_slice %75 {offsets = [16, 0], sizes = [1, 128], strides = [1, 1]} : vector<18x128xf32> to vector<1x128xf32>
    %78 = vector.extract_strided_slice %75 {offsets = [17, 0], sizes = [1, 128], strides = [1, 1]} : vector<18x128xf32> to vector<1x128xf32>
    %79 = arith.mulf %77, %77 : vector<1x128xf32>
    %80 = arith.subf %78, %79 : vector<1x128xf32>
    %cst_33 = arith.constant 0.000000e+00 : f32
    %81 = vector.broadcast %cst_33 : f32 to vector<1x128xf32>
    %82 = arith.maximumf %80, %81 : vector<1x128xf32>
    %cst_34 = arith.constant 9.99999974E-6 : f32
    %83 = vector.broadcast %cst_34 : f32 to vector<1x128xf32>
    %84 = arith.addf %82, %83 : vector<1x128xf32>
    %85 = math.rsqrt %84 : vector<1x128xf32>
    %c2_35 = arith.constant 2 : index
    %c0_36 = arith.constant 0 : index
    %c0_37 = arith.constant 0 : index
    %86 = vector.load %arg6[%c2_35, %c0_36, %c0_37] : memref<4x16x1xf32, #tpu.memory_space<vmem>>, vector<1x16x1xf32>
    %87 = vector.shape_cast %86 : vector<1x16x1xf32> to vector<16x1xf32>
    %88 = vector.broadcast %77 : vector<1x128xf32> to vector<16x128xf32>
    %89 = vector.broadcast %87 : vector<16x1xf32> to vector<16x128xf32>
    %90 = arith.mulf %88, %89 : vector<16x128xf32>
    %91 = arith.subf %76, %90 : vector<16x128xf32>
    %92 = vector.broadcast %85 : vector<1x128xf32> to vector<16x128xf32>
    %93 = arith.mulf %92, %91 : vector<16x128xf32>
    %c2_38 = arith.constant 2 : index
    %c0_39 = arith.constant 0 : index
    %c0_40 = arith.constant 0 : index
    %94 = vector.load %arg5[%c2_38, %c0_39, %c0_40] : memref<4x16x1xf32, #tpu.memory_space<vmem>>, vector<1x16x1xf32>
    %95 = vector.shape_cast %94 : vector<1x16x1xf32> to vector<16x1xf32>
    %96 = vector.broadcast %95 : vector<16x1xf32> to vector<16x128xf32>
    %97 = arith.addf %93, %96 : vector<16x128xf32>
    %cst_41 = arith.constant 0.000000e+00 : f32
    %98 = vector.broadcast %cst_41 : f32 to vector<16x128xf32>
    %99 = arith.maximumf %97, %98 : vector<16x128xf32>
    %100 = arith.truncf %99 : vector<16x128xf32> to vector<16x128xbf16>
    %101 = arith.mulf %100, %100 : vector<16x128xbf16>
    %102 = tpu.concatenate %100, %101 in 0 : vector<16x128xbf16>, vector<16x128xbf16> -> vector<32x128xbf16>
    %c3 = arith.constant 3 : index
    %c0_42 = arith.constant 0 : index
    %c0_43 = arith.constant 0 : index
    %103 = vector.load %arg4[%c3, %c0_42, %c0_43] : memref<4x18x32xbf16, #tpu.memory_space<vmem>>, vector<1x18x32xbf16>
    %104 = vector.shape_cast %103 : vector<1x18x32xbf16> to vector<18x32xbf16>
    %cst_44 = arith.constant dense<0.000000e+00> : vector<18x128xf32>
    %105 = tpu.matmul %104, %102, %cst_44 {dimension_numbers = #tpu.dot_dimension_numbers<[1], [0], [0], [1], [0, 0, 1, 1], [], []>} : vector<18x32xbf16>, vector<32x128xbf16>, vector<18x128xf32> -> vector<18x128xf32>
    %106 = vector.extract_strided_slice %105 {offsets = [0, 0], sizes = [16, 128], strides = [1, 1]} : vector<18x128xf32> to vector<16x128xf32>
    %107 = vector.extract_strided_slice %105 {offsets = [16, 0], sizes = [1, 128], strides = [1, 1]} : vector<18x128xf32> to vector<1x128xf32>
    %108 = vector.extract_strided_slice %105 {offsets = [17, 0], sizes = [1, 128], strides = [1, 1]} : vector<18x128xf32> to vector<1x128xf32>
    %109 = arith.mulf %107, %107 : vector<1x128xf32>
    %110 = arith.subf %108, %109 : vector<1x128xf32>
    %cst_45 = arith.constant 0.000000e+00 : f32
    %111 = vector.broadcast %cst_45 : f32 to vector<1x128xf32>
    %112 = arith.maximumf %110, %111 : vector<1x128xf32>
    %cst_46 = arith.constant 9.99999974E-6 : f32
    %113 = vector.broadcast %cst_46 : f32 to vector<1x128xf32>
    %114 = arith.addf %112, %113 : vector<1x128xf32>
    %115 = math.rsqrt %114 : vector<1x128xf32>
    %c3_47 = arith.constant 3 : index
    %c0_48 = arith.constant 0 : index
    %c0_49 = arith.constant 0 : index
    %116 = vector.load %arg6[%c3_47, %c0_48, %c0_49] : memref<4x16x1xf32, #tpu.memory_space<vmem>>, vector<1x16x1xf32>
    %117 = vector.shape_cast %116 : vector<1x16x1xf32> to vector<16x1xf32>
    %118 = vector.broadcast %107 : vector<1x128xf32> to vector<16x128xf32>
    %119 = vector.broadcast %117 : vector<16x1xf32> to vector<16x128xf32>
    %120 = arith.mulf %118, %119 : vector<16x128xf32>
    %121 = arith.subf %106, %120 : vector<16x128xf32>
    %122 = vector.broadcast %115 : vector<1x128xf32> to vector<16x128xf32>
    %123 = arith.mulf %122, %121 : vector<16x128xf32>
    %c3_50 = arith.constant 3 : index
    %c0_51 = arith.constant 0 : index
    %c0_52 = arith.constant 0 : index
    %124 = vector.load %arg5[%c3_50, %c0_51, %c0_52] : memref<4x16x1xf32, #tpu.memory_space<vmem>>, vector<1x16x1xf32>
    %125 = vector.shape_cast %124 : vector<1x16x1xf32> to vector<16x1xf32>
    %126 = vector.broadcast %125 : vector<16x1xf32> to vector<16x128xf32>
    %127 = arith.addf %123, %126 : vector<16x128xf32>
    %cst_53 = arith.constant 0.000000e+00 : f32
    %128 = vector.broadcast %cst_53 : f32 to vector<16x128xf32>
    %129 = arith.maximumf %127, %128 : vector<16x128xf32>
    %c0_54 = arith.constant 0 : index
    %c0_55 = arith.constant 0 : index
    %130 = vector.load %arg7[%c0_54, %c0_55] : memref<1x16xbf16, #tpu.memory_space<vmem>>, vector<1x16xbf16>
    %131 = arith.truncf %129 : vector<16x128xf32> to vector<16x128xbf16>
    %cst_56 = arith.constant dense<0.000000e+00> : vector<1x128xf32>
    %132 = tpu.matmul %130, %131, %cst_56 {dimension_numbers = #tpu.dot_dimension_numbers<[1], [0], [0], [1], [0, 0, 1, 1], [], []>} : vector<1x16xbf16>, vector<16x128xbf16>, vector<1x128xf32> -> vector<1x128xf32>
    %c0_57 = arith.constant 0 : index
    %c0_58 = arith.constant 0 : index
    %133 = vector.load %arg8[%c0_57, %c0_58] : memref<1x1xf32, #tpu.memory_space<vmem>>, vector<1x1xf32>
    %134 = vector.broadcast %133 : vector<1x1xf32> to vector<1x128xf32>
    %135 = arith.addf %132, %134 : vector<1x128xf32>
    %136 = arith.addf %135, %3 : vector<1x128xf32>
    %137 = math.tanh %136 : vector<1x128xf32>
    %cst_59 = arith.constant 0.00999999977 : f32
    %138 = vector.broadcast %cst_59 : f32 to vector<1x128xf32>
    %139 = arith.mulf %138, %136 : vector<1x128xf32>
    %140 = arith.addf %137, %139 : vector<1x128xf32>
    %c0_60 = arith.constant 0 : index
    %c0_61 = arith.constant 0 : index
    %141 = vector.load %arg9[%c0_60, %c0_61] : memref<1x128xf32, #tpu.memory_space<vmem>>, vector<1x128xf32>
    tpu.vector_store %arg9[%c0_60, %c0_61], %140 {strides = array<i32>} : memref<1x128xf32, #tpu.memory_space<vmem>>, vector<1x128xf32>,
    return
  }
  func.func @transform_0(%arg0: i32) -> (i32, i32) {
    %c0_i32 = arith.constant 0 : i32
    %c0_i32_0 = arith.constant 0 : i32
    return %c0_i32, %arg0 : i32, i32
  }
  func.func @transform_1(%arg0: i32) -> (i32, i32) {
    %c0_i32 = arith.constant 0 : i32
    %c0_i32_0 = arith.constant 0 : i32
    %c0_i32_1 = arith.constant 0 : i32
    return %c0_i32, %c0_i32_0 : i32, i32
  }
  func.func @transform_2(%arg0: i32) -> (i32, i32) {
    %c0_i32 = arith.constant 0 : i32
    %c0_i32_0 = arith.constant 0 : i32
    %c0_i32_1 = arith.constant 0 : i32
    return %c0_i32, %c0_i32_0 : i32, i32
  }
  func.func @transform_3(%arg0: i32) -> (i32, i32, i32) {
    %c0_i32 = arith.constant 0 : i32
    %c0_i32_0 = arith.constant 0 : i32
    %c0_i32_1 = arith.constant 0 : i32
    %c0_i32_2 = arith.constant 0 : i32
    return %c0_i32, %c0_i32_0, %c0_i32_1 : i32, i32, i32
  }
  func.func @transform_4(%arg0: i32) -> (i32, i32, i32) {
    %c0_i32 = arith.constant 0 : i32
    %c0_i32_0 = arith.constant 0 : i32
    %c0_i32_1 = arith.constant 0 : i32
    %c0_i32_2 = arith.constant 0 : i32
    return %c0_i32, %c0_i32_0, %c0_i32_1 : i32, i32, i32
  }
  func.func @transform_5(%arg0: i32) -> (i32, i32, i32) {
    %c0_i32 = arith.constant 0 : i32
    %c0_i32_0 = arith.constant 0 : i32
    %c0_i32_1 = arith.constant 0 : i32
    %c0_i32_2 = arith.constant 0 : i32
    return %c0_i32, %c0_i32_0, %c0_i32_1 : i32, i32, i32
  }
  func.func @transform_6(%arg0: i32) -> (i32, i32) {
    %c0_i32 = arith.constant 0 : i32
    %c0_i32_0 = arith.constant 0 : i32
    %c0_i32_1 = arith.constant 0 : i32
    return %c0_i32, %c0_i32_0 : i32, i32
  }
  func.func @transform_7(%arg0: i32) -> (i32, i32) {
    %c0_i32 = arith.constant 0 : i32
    %c0_i32_0 = arith.constant 0 : i32
    %c0_i32_1 = arith.constant 0 : i32
    return %c0_i32, %c0_i32_0 : i32, i32
  }
  func.func @transform_8(%arg0: i32) -> (i32, i32) {
    %c0_i32 = arith.constant 0 : i32
    %c0_i32_0 = arith.constant 0 : i32
    return %c0_i32, %arg0 : i32, i32
  }
}

</mosaic_0001>

<bundles_post_ra>
// kernel: tpu_custom_call.1
= control target key start
LH: loop header
LB: loop body
LE: loop exit
PB: predicated region body
PF: predicated region fallthrough
CT: control target
= control target key end

     0   :  { %s1492_s0 = inlined_call_operand.vmem [shape: f32[2,256], index: 0, kind: input, shape index: {}]   ;;  %s1493_s1 = inlined_call_operand.vmem [shape: bf16[16,2], index: 1, kind: input, shape index: {}]   ;;  %s1494_s2 = inlined_call_operand.vmem [shape: f32[16,1], index: 2, kind: input, shape index: {}]   ;;  %s1495_s3 = inlined_call_operand.vmem [shape: bf16[4,18,32], index: 3, kind: input, shape index: {}]   ;;  %s1496_s4 = inlined_call_operand.vmem [shape: f32[4,16,1], index: 4, kind: input, shape index: {}]   ;;  %s1497_s5 = inlined_call_operand.vmem [shape: f32[4,16,1], index: 5, kind: input, shape index: {}]   ;;  %s1498_s6 = inlined_call_operand.vmem [shape: bf16[1,16], index: 6, kind: input, shape index: {}]   ;;  %s1499_s7 = inlined_call_operand.<no memory space> [shape: f32[1,1], index: 7, kind: input, shape index: {}]   ;;  %s1500_s8 = inlined_call_operand.hbm [shape: f32[1,256], index: 8, kind: output, shape index: {}]  }
   0x1   :  { %v13_v0 = vstv %s1499_s7 }
   0x2   :  { %14 = vst [vmem:[#allocation2] sm:$0x1] %v13_v0 }
   0x3   :  { %15 = vsyncpa [#allocation4], 0 }
   0x4   :  { %17 = vsyncpa [#allocation4 + $0x1], 0  ;;  %s1275_s29 = smov 0   ;;  %s1277_s30 = smov 0  }
   0x5   :  { %s1279_s9 = smov 0   ;;  %s1281_s10 = smov 0  }
   0x6 LB: > { %s1296_s7 = sadd.s32 4294967295, %s1221_s10   ;;  %s984_s11 = sadd.s32 4294967294, %s1221_s10   ;;  %s1221_s10 = sphi %s1281_s10, %s1506_s10   ;;  %s1217_s9 = sphi %s1279_s9, %s1505_s9   ;;  %s1213_s30 = sphi %s1277_s30, %s1504_s30   ;;  %s1209_s29 = sphi %s1275_s29, %s1503_s29  }
   0x7   : > { %s1300_s12 = sadd.s32 1, %s1221_s10   ;;  %s203_s13 = sadd.s32 1, %s1217_s9 }
   0x8   : > { %s200_s14 = ssub.s32 %s1221_s10, %s1300_s12  ;;  %p213_p0 = scmp.ne.s32.totalorder %s1217_s9, %s1213_s30 }
   0x9   : > { %p201_p1 = scmp.eq.s32.totalorder %s200_s14, 0  ;;  %p214_p2 = scmp.eq.s32.totalorder %s1296_s7, 1 }
   0xa   : > { %p219_p3 = scmp.ne.s32.totalorder %s1213_s30, %s1209_s29  ;;  %p220_p4 = scmp.eq.s32.totalorder %s984_s11, 1 }
   0xb   : > { %s1311_s15 = scalar_select %p201_p1, %s1217_s9, %s203_s13  }
   0xc   : > { %p1313_p5 = por %p214_p2, %p213_p0  ;;  %p1317_p6 = por %p220_p4, %p219_p3 }
   0xd   : > { %p987_p7 = scmp.ge.s32.totalorder %s1221_s10, 1  ;;  %p266_p8 = scmp.lt.s32.totalorder %s1221_s10, 3 }
   0xf   : > { %p267_p9 = pnand %p987_p7, %p266_p8 }
  0x10   : > { %p298_p10 = scmp.lt.s32.totalorder (!%p267_p9), %s1296_s7, 1  ;;  %v1223_v1 = vmov (!%p267_p9), 0.0   ;;  %vm1224_vm0 = vmmov (!%p267_p9), 0   ;;  %v311_v2 = vld [vmem:[%s1494_s2] sm:$0xff] (!%p267_p9)  ;;  %v1225_v3 = vmov (!%p267_p9), 0   ;;  %vm332_vm1 = vcmask (!%p267_p9), 1040384  }
  0x11   : > { %270 = sbr.rel (%p267_p9) target bundleno = 1503 (0x5df), region = 52  ;;  %1052 = vmatprep.subr.bf16.mxu0 (!%p267_p9), %v1223_v1  ;;  %1054 = vmatprep.mubr.msk.bf16.mxu0 (!%p267_p9), %vm1224_vm0, %v1223_v1  ;;  %v312_v4 = vld [vmem:[%s1494_s2 + $0x8] sm:$0xff] (!%p267_p9)  ;;  %v479_v6 = vld [vmem:[%s1496_s4] sm:$0xff] (!%p267_p9)  ;;  %vm328_vm2 = vcmask (!%p267_p9), 15360   ;;  %v1002_v10 = vld [vmem:[%s1497_s5 + $0x10] sm:$0xff] (!%p267_p9)  ;;  %vm390_vm3 = vcmask (!%p267_p9), 261120   ;;  %v455_v39 = vlaneseq (!%p267_p9) }
  0x12   : > { %1138 = vset.pattern.permute.xlu0 (!%p267_p9), %v1225_v3  ;;  %1139 = vset.pattern.permute.xlu1 (!%p267_p9), %v1225_v3  ;;  %v1140_v9 = vld [vmem:[%s1493_s1] sm:$0xff] (!%p267_p9)   ;;  %v1004_v11 = vld [vmem:[%s1496_s4 + $0x10] sm:$0xff] (!%p267_p9)  ;;  %v454_v19 = vld [vmem:[%s1497_s5 + $0x8] sm:$0xff] (!%p267_p9)  ;;  %vm867_vm4 = vcmask (!%p267_p9), 130048   ;;  %s296_s23 = sand.u32 (!%p267_p9), 1, %s1213_s30   ;;  %s1029_s24 = sshll.u32 (!%p267_p9), %s1296_s7, 4 }
  0x13   : > { %315 = vperm.xlu0 (!%p267_p9), %1138, %v311_v2   ;;  %v1013_v12 = vld [vmem:[%s1497_s5 + $0x20] sm:$0xff] (!%p267_p9)  ;;  %v1024_v14 = vld [vmem:[%s1497_s5 + $0x30] sm:$0xff] (!%p267_p9)  ;;  %v480_v20 = vld [vmem:[%s1496_s4 + $0x8] sm:$0xff] (!%p267_p9)  ;;  %v456_v40 = vshrl.u32 (!%p267_p9), %v455_v39, 7  ;;  %s297_s25 = scalar_lea.vmem (!%p267_p9), [#allocation3], %s296_s23  ;;  %s1450_s11 = scalar_lea.hbm (!%p267_p9), %s1500_s8, %s1029_s24 }
  0x14   : > { %v1015_v13 = vld [vmem:[%s1496_s4 + $0x20] sm:$0xff] (!%p267_p9)  ;;  %v1026_v15 = vld [vmem:[%s1496_s4 + $0x30] sm:$0xff] (!%p267_p9)  ;;  %v1003_v21 = vld [vmem:[%s1497_s5 + $0x18] sm:$0xff] (!%p267_p9)  ;;  %s917_s13 = scalar_lea.sflag (!%p267_p9), [#allocation4], %s296_s23 }
  0x15   : > { %v857_v16 = vld [vmem:[#allocation2] sm:$0x1] (!%p267_p9)  ;;  %v1005_v22 = vld [vmem:[%s1496_s4 + $0x18] sm:$0xff] (!%p267_p9)  ;;  %v1014_v23 = vld [vmem:[%s1497_s5 + $0x28] sm:$0xff] (!%p267_p9)  ;;  %v1404_v42 = vsub.s32 (!%p267_p9), 0, %v456_v40  ;;  %v1407_v58 = vsub.s32 (!%p267_p9), 1, %v456_v40 }
  0x16   : > { %v1141_v17 = vld [vmem:[%s1495_s3] sm:$0xff] (!%p267_p9)   ;;  %v1016_v24 = vld [vmem:[%s1496_s4 + $0x28] sm:$0xff] (!%p267_p9)  ;;  %v1025_v25 = vld [vmem:[%s1497_s5 + $0x38] sm:$0xff] (!%p267_p9) }
  0x17   : > { %320 = vperm.xlu0 (!%p267_p9), %1138, %v312_v4   ;;  %1062 = vmatprep.mubr.msk.bf16.mxu1 (!%p267_p9), %vm390_vm3, %v1141_v17  ;;  %v453_v18 = vld [vmem:[%s1497_s5] sm:$0xff] (!%p267_p9)  ;;  %v1027_v26 = vld [vmem:[%s1496_s4 + $0x38] sm:$0xff] (!%p267_p9)  ;;  %v1142_v37 = vld [vmem:[%s1495_s3 + $0x8] ss:$0 sps:$4 sm:$0x11] (!%p267_p9)  }
  0x18   : > { %s299_s20 = scalar_select %p298_p10, %s1296_s7, 1  ;;  %461 = vperm.xlu1 %1139, %v453_v18   ;;  %v1143_v38 = vld [vmem:[%s1495_s3 + $0xc] sm:$0xff]   ;;  %v1146_v39 = vld [vmem:[%s1495_s3 + $0x20] ss:$0 sps:$4 sm:$0x11]   ;;  %v1147_v40 = vld [vmem:[%s1495_s3 + $0x24] sm:$0xff]  }
  0x19   : > { %s1226_s7 = smov [#allocation3]  }
  0x1a   : > { %s988_s21 = sshll.u32 %s299_s20, 1  ;;  %s1163_s18 = sshll.u32 %s1226_s7, 4  ;;  %s1164_s18 = int_to_ptr.vmem [resolvable:$false] %s1163_s18 }
  0x1b   : > { %s301_s26 = scalar_lea.vmem %s1492_s0, %s988_s21  ;;  %483 = vperm.xlu0 %1138, %v479_v6   ;;  %s1165_s19 = scalar_lea.vmem %s1164_s18, 32 }
  0x1c   : > { %v1337_v5 = vld [vmem:[%s301_s26] sm:$0x3]  ;;  %466 = vperm.xlu1 %1139, %v454_v19   ;;  %s929_s26 = sshll.u32 %s297_s25, 4  ;;  %s1452_s26 = int_to_ptr.vmem [resolvable:$true] %s929_s26 }
  0x1d   : > { %v310_v7 = vpack.c.bf16 %v1337_v5, %v1337_v5  ;;  %s1159_s14 = scalar_lea.vmem %s1452_s26, 16  ;;  %p1166_p0 = scmp.lt.s32.totalorder %s1452_s26, %s1164_s18 }
  0x1e   : > { %p1160_p11 = scmp.ne.s32.totalorder %s1452_s26, %s1159_s14  ;;  %p1167_p1 = scmp.lt.s32.totalorder %s1165_s19, %s1159_s14 }
  0x1f   : > { %v334_v8 = vsel %vm332_vm1, %v310_v7, 0  ;;  %580 = vperm.xlu0 %1138, %v1002_v10   ;;  %v1145_v10 = vld [vmem:[%s1495_s3 + $0x18] sm:$0xff]  }
  0x20   : > { %1053 = vmatpush3.bf16.msra.mxu0 %v334_v8  ;;  %488 = vperm.xlu1 %1139, %v480_v20   ;;  %p1161_p12 = pnand %p1160_p11, %p1313_p5  ;;  %p1168_p2 = por %p1167_p1, %p1166_p0 }
  0x22   : > { %p1162_p13 = pneg %p1161_p12 }
  0x23   : > { %1055 = vmatmul.mubr.msk.bf16.vlgmr.msra.gmra.mrb[0].mxu0 %vm328_vm2, %v1140_v9  ;;  %603 = vperm.xlu0 %1138, %v1004_v11   ;;  %v1144_v9 = vld [vmem:[%s1495_s3 + $0x14] ss:$0 sps:$4 sm:$0x11]  }
  0x24   : > { %585 = vperm.xlu1 %1139, %v1003_v21   ;;  %1070 = vmatprep.mubr.msk.bf16.mxu0 %vm390_vm3, %v1143_v38  ;;  %p1169_p3 = pnand %p1168_p2, %p1162_p13 }
  0x27   : > { %700 = vperm.xlu0 %1138, %v1013_v12  }
  0x28   : > { %608 = vperm.xlu1 %1139, %v1005_v22  }
  0x2b   : > { %723 = vperm.xlu0 %1138, %v1015_v13  }
  0x2c   : > { %705 = vperm.xlu1 %1139, %v1014_v23  }
  0x2f   : > { %820 = vperm.xlu0 %1138, %v1024_v14  }
  0x30   : > { %728 = vperm.xlu1 %1139, %v1016_v24  }
  0x33   : > { %843 = vperm.xlu0 %1138, %v1026_v15  }
  0x34   : > { %825 = vperm.xlu1 %1139, %v1025_v25  }
  0x37   : > { %860 = vperm.xlu0 %1138, %v857_v16  }
  0x38   : > { %848 = vperm.xlu1 %1139, %v1027_v26  }
  0x92   : > { %v316_v27 = vpop.permute.xlu0 %315 }
  0x96   : > { %v321_v30 = vpop.permute.xlu0 %320 }
  0x97   : > { %v462_v41 = vpop.permute.xlu1 %461 }
  0x9a   : > { %v484_v63 = vpop.permute.xlu0 %483 }
  0x9b   : > { %v467_v47 = vpop.permute.xlu1 %466 }
  0x9e   : > { %v581_v12 = vpop.permute.xlu0 %580 }
  0x9f   : > { %v489_v0 = vpop.permute.xlu1 %488 }
  0xa3   : > { %v586_v16 = vpop.permute.xlu1 %585 }
  0xf6   : > { %v370_v28 = vpop.f32.mrb[0].mxu0 }
  0xf7   : > { %v1056_v29 = vpop.f32.mrb[1].mxu0  ;;  %v371_v32 = vadd.f32 %v370_v28, %v316_v27 }
  0xf8   : > { %v373_v31 = vpop.f32.mrb[2].mxu0 }
  0xf9   : > { %v374_v33 = vadd.f32 %v373_v31, %v321_v30  ;;  %v1057_v34 = vpop.f32.mrb[3].mxu0  ;;  %v604_v31 = vpop.permute.xlu0 %603 }
  0xfb   : > { %v377_v35 = vpack.c.bf16 %v374_v33, %v371_v32  ;;  %v609_v32 = vpop.permute.xlu1 %608 }
  0xfd   : > { %1058 = vmatprep.subr.bf16.mxu1 %v377_v35  ;;  %v378_v36 = vmul.bf16 %v377_v35, %v377_v35 }
  0xfe   : > { %1059 = vmatpush3.bf16.msra.mxu1 %v377_v35 }
  0xff   : > { %1060 = vmatprep.subr.bf16.mxu1 %v378_v36 }
 0x102   : > { %1061 = vmatpush3.bf16.msra.mxu1 %v378_v36 }
 0x105   : > { %1063 = vmatmul.mubr.msk.bf16.vlgmr.msra.gmra.mrb[0].mxu1 %vm390_vm3, %v1142_v37 }
 0x106   : > { %1078 = vmatprep.mubr.msk.bf16.mxu1 %vm390_vm3, %v1145_v10 }
 0x1d8   : > { %v1064_v43 = vpop.f32.mrb[0].mxu1 }
 0x1d9   : > { %v445_v44 = vmul.f32 %v1064_v43, %v1064_v43  ;;  %v458_v45 = vrot.slane %v1064_v43, %v1404_v42  ;;  %v431_v46 = vpop.f32.mrb[1].mxu1 }
 0x1da   : > { %v1065_v48 = vpop.f32.mrb[2].mxu1 }
 0x1db   : > { %v447_v49 = vrot.slane %v445_v44, 7  ;;  %v469_v50 = vmul.f32 %v462_v41, %v458_v45  ;;  %v434_v51 = vpop.f32.mrb[3].mxu1  ;;  %v470_v52 = vmul.f32 %v467_v47, %v458_v45  ;;  %v706_v47 = vpop.permute.xlu1 %705 }
 0x1dd   : > { %v449_v53 = vsub.f32 %v1064_v43, %v447_v49  ;;  %v471_v54 = vsub.f32 %v431_v46, %v469_v50  ;;  %v472_v55 = vsub.f32 %v434_v51, %v470_v52  ;;  %v701_v43 = vpop.permute.xlu0 %700 }
 0x1df   : > { %v450_v56 = vmax.f32 %v449_v53, 0.0 }
 0x1e1   : > { %v451_v57 = vadd.f32 1e-05, %v450_v56 }
 0x1e3   : > { %1149 = vrsqrt.f32 %v451_v57 }
 0x1ed   : > { %v1150_v59 = vpop.eup %1149 }
 0x1ee   : > { %v476_v60 = vrot.slane %v1150_v59, %v1407_v58 }
 0x1f0   : > { %v477_v61 = vmul.f32 %v476_v60, %v471_v54  ;;  %v478_v62 = vmul.f32 %v476_v60, %v472_v55 }
 0x1f2   : > { %v491_v2 = vadd.f32 %v484_v63, %v477_v61  ;;  %v492_v3 = vadd.f32 %v489_v0, %v478_v62  ;;  %v724_v62 = vpop.permute.xlu0 %723  ;;  %v729_v63 = vpop.permute.xlu1 %728 }
 0x1f4   : > { %v493_v4 = vmax.f32 %v491_v2, 0.0  ;;  %v494_v6 = vmax.f32 %v492_v3, 0.0 }
 0x1f6   : > { %v495_v7 = vpack.c.bf16 %v494_v6, %v493_v4  ;;  %v821_v10 = vpop.permute.xlu0 %820 }
 0x1f8   : > { %1066 = vmatprep.subr.bf16.mxu0 %v495_v7  ;;  %v496_v8 = vmul.bf16 %v495_v7, %v495_v7 }
 0x1f9   : > { %1067 = vmatpush3.bf16.msra.mxu0 %v495_v7 }
 0x1fa   : > { %1068 = vmatprep.subr.bf16.mxu0 %v496_v8 }
 0x1fd   : > { %1069 = vmatpush3.bf16.msra.mxu0 %v496_v8  ;;  %v1148_v8 = vld [vmem:[%s1495_s3 + $0x2c] ss:$0 sps:$4 sm:$0x11]  }
 0x200   : > { %1071 = vmatmul.mubr.msk.bf16.vlgmr.msra.gmra.mrb[4].mxu0 %vm390_vm3, %v1144_v9 }
 0x201   : > { %1086 = vmatprep.mubr.msk.bf16.mxu0 %vm390_vm3, %v1147_v40 }
 0x2d3   : > { %v1072_v11 = vpop.f32.mrb[4].mxu0 }
 0x2d4   : > { %v563_v13 = vmul.f32 %v1072_v11, %v1072_v11  ;;  %v577_v14 = vrot.slane %v1072_v11, %v1404_v42  ;;  %v549_v15 = vpop.f32.mrb[5].mxu0 }
 0x2d5   : > { %v1073_v17 = vpop.f32.mrb[6].mxu0 }
 0x2d6   : > { %v565_v18 = vrot.slane %v563_v13, 7  ;;  %v588_v19 = vmul.f32 %v581_v12, %v577_v14  ;;  %v552_v20 = vpop.f32.mrb[7].mxu0  ;;  %v589_v21 = vmul.f32 %v586_v16, %v577_v14  ;;  %v826_v14 = vpop.permute.xlu1 %825 }
 0x2d8   : > { %v567_v22 = vsub.f32 %v1072_v11, %v565_v18  ;;  %v590_v23 = vsub.f32 %v549_v15, %v588_v19  ;;  %v591_v24 = vsub.f32 %v552_v20, %v589_v21 }
 0x2da   : > { %v568_v25 = vmax.f32 %v567_v22, 0.0 }
 0x2dc   : > { %v569_v26 = vadd.f32 1e-05, %v568_v25 }
 0x2de   : > { %1151 = vrsqrt.f32 %v569_v26 }
 0x2e8   : > { %v1152_v27 = vpop.eup %1151 }
 0x2e9   : > { %v595_v28 = vrot.slane %v1152_v27, %v1407_v58 }
 0x2eb   : > { %v596_v29 = vmul.f32 %v595_v28, %v590_v23  ;;  %v597_v30 = vmul.f32 %v595_v28, %v591_v24 }
 0x2ed   : > { %v611_v33 = vadd.f32 %v604_v31, %v596_v29  ;;  %v612_v34 = vadd.f32 %v609_v32, %v597_v30  ;;  %v844_v29 = vpop.permute.xlu0 %843  ;;  %v849_v30 = vpop.permute.xlu1 %848 }
 0x2ef   : > { %v613_v35 = vmax.f32 %v611_v33, 0.0  ;;  %v614_v36 = vmax.f32 %v612_v34, 0.0 }
 0x2f1   : > { %v615_v37 = vpack.c.bf16 %v614_v36, %v613_v35  ;;  %v855_v36 = vld [vmem:[%s1498_s6] sm:$0x1] }
 0x2f3   : > { %1074 = vmatprep.subr.bf16.mxu1 %v615_v37  ;;  %v616_v38 = vmul.bf16 %v615_v37, %v615_v37 }
 0x2f4   : > { %1075 = vmatpush3.bf16.msra.mxu1 %v615_v37  ;;  %v861_v37 = vpop.permute.xlu0 %860 }
 0x2f5   : > { %1076 = vmatprep.subr.bf16.mxu1 %v616_v38 }
 0x2f8   : > { %1077 = vmatpush3.bf16.msra.mxu1 %v616_v38  ;;  %v866_v38 = vrot.slane %v861_v37, %v1404_v42 }
 0x2f9   : > { %1090 = vmatprep.subr.bf16.mxu1 %v1223_v1 }
 0x2fb   : > { %1079 = vmatmul.mubr.msk.bf16.vlgmr.msra.gmra.mrb[4].mxu1 %vm390_vm3, %v1146_v39 }
 0x2fc   : > { %1092 = vmatprep.mubr.msk.bf16.mxu1 %vm1224_vm0, %v1223_v1 }
 0x3ce   : > { %v1080_v41 = vpop.f32.mrb[4].mxu1 }
 0x3cf   : > { %v683_v44 = vmul.f32 %v1080_v41, %v1080_v41  ;;  %v697_v45 = vrot.slane %v1080_v41, %v1404_v42  ;;  %v669_v46 = vpop.f32.mrb[5].mxu1 }
 0x3d0   : > { %v1081_v48 = vpop.f32.mrb[6].mxu1 }
 0x3d1   : > { %v685_v49 = vrot.slane %v683_v44, 7  ;;  %v708_v50 = vmul.f32 %v701_v43, %v697_v45  ;;  %v672_v51 = vpop.f32.mrb[7].mxu1  ;;  %v709_v52 = vmul.f32 %v706_v47, %v697_v45 }
 0x3d3   : > { %v687_v53 = vsub.f32 %v1080_v41, %v685_v49  ;;  %v710_v1 = vsub.f32 %v669_v46, %v708_v50  ;;  %v711_v54 = vsub.f32 %v672_v51, %v709_v52 }
 0x3d5   : > { %v688_v55 = vmax.f32 %v687_v53, 0.0 }
 0x3d7   : > { %v689_v56 = vadd.f32 1e-05, %v688_v55 }
 0x3d9   : > { %1153 = vrsqrt.f32 %v689_v56 }
 0x3e3   : > { %v1154_v57 = vpop.eup %1153 }
 0x3e4   : > { %v715_v59 = vrot.slane %v1154_v57, %v1407_v58 }
 0x3e6   : > { %v716_v60 = vmul.f32 %v715_v59, %v710_v1  ;;  %v717_v61 = vmul.f32 %v715_v59, %v711_v54 }
 0x3e8   : > { %v731_v0 = vadd.f32 %v724_v62, %v716_v60  ;;  %v732_v2 = vadd.f32 %v729_v63, %v717_v61 }
 0x3ea   : > { %v733_v3 = vmax.f32 %v731_v0, 0.0  ;;  %v734_v4 = vmax.f32 %v732_v2, 0.0 }
 0x3ec   : > { %v735_v6 = vpack.c.bf16 %v734_v4, %v733_v3 }
 0x3ee   : > { %1082 = vmatprep.subr.bf16.mxu0 %v735_v6  ;;  %v736_v7 = vmul.bf16 %v735_v6, %v735_v6 }
 0x3ef   : > { %1083 = vmatpush3.bf16.msra.mxu0 %v735_v6 }
 0x3f0   : > { %1084 = vmatprep.subr.bf16.mxu0 %v736_v7 }
 0x3f3   : > { %1085 = vmatpush3.bf16.msra.mxu0 %v736_v7 }
 0x3f6   : > { %1087 = vmatmul.mubr.msk.bf16.vlgmr.msra.gmra.mrb[8].mxu0 %vm390_vm3, %v1148_v8 }
 0x4c9   : > { %v1088_v9 = vpop.f32.mrb[8].mxu0 }
 0x4ca   : > { %v803_v11 = vmul.f32 %v1088_v9, %v1088_v9  ;;  %v817_v12 = vrot.slane %v1088_v9, %v1404_v42  ;;  %v789_v13 = vpop.f32.mrb[9].mxu0 }
 0x4cb   : > { %v1089_v15 = vpop.f32.mrb[10].mxu0 }
 0x4cc   : > { %v805_v16 = vrot.slane %v803_v11, 7  ;;  %v828_v17 = vmul.f32 %v821_v10, %v817_v12  ;;  %v792_v18 = vpop.f32.mrb[11].mxu0  ;;  %v829_v19 = vmul.f32 %v826_v14, %v817_v12 }
 0x4ce   : > { %v807_v20 = vsub.f32 %v1088_v9, %v805_v16  ;;  %v830_v21 = vsub.f32 %v789_v13, %v828_v17  ;;  %v831_v22 = vsub.f32 %v792_v18, %v829_v19 }
 0x4d0   : > { %v808_v23 = vmax.f32 %v807_v20, 0.0 }
 0x4d2   : > { %v809_v24 = vadd.f32 1e-05, %v808_v23 }
 0x4d4   : > { %1155 = vrsqrt.f32 %v809_v24 }
 0x4de   : > { %v1156_v25 = vpop.eup %1155 }
 0x4df   : > { %v835_v26 = vrot.slane %v1156_v25, %v1407_v58  ;;  %v305_v58 = vrot.slane %v1337_v5, 1 }
 0x4e1   : > { %v836_v27 = vmul.f32 %v835_v26, %v830_v21  ;;  %v837_v28 = vmul.f32 %v835_v26, %v831_v22  ;;  %v307_v39 = vadd.f32 %v305_v58, %v1337_v5 }
 0x4e3   : > { %v851_v31 = vadd.f32 %v844_v29, %v836_v27  ;;  %v852_v32 = vadd.f32 %v849_v30, %v837_v28 }
 0x4e5   : > { %v853_v33 = vmax.f32 %v851_v31, 0.0  ;;  %v854_v34 = vmax.f32 %v852_v32, 0.0 }
 0x4e7   : > { %v856_v35 = vpack.c.bf16 %v854_v34, %v853_v33 }
 0x4e9   : > { %1091 = vmatpush3.bf16.msra.mxu1 %v856_v35 }
 0x4ec   : > { %1093 = vmatmul.mubr.msk.bf16.vlgmr.msra.gmra.mrb[8].mxu1 %vm867_vm4, %v855_v36 }
 0x5bf   : > { %v905_v40 = vpop.f32.mrb[8].mxu1 }
 0x5c0   : > { %v906_v41 = vadd.f32 %v905_v40, %v866_v38  ;;  %v1094_v43 = vpop.f32.mrb[9].mxu1 }
 0x5c1   : > { %v908_v44 = vpop.f32.mrb[10].mxu1 }
 0x5c2   : > { %v911_v45 = vadd.f32 %v906_v41, %v307_v39  ;;  %v1095_v46 = vpop.f32.mrb[11].mxu1 }
 0x5c4   : > { %1157 = vtanh.f32 %v911_v45  ;;  %v913_v47 = vmul.f32 0.01, %v911_v45 }
 0x5ce   : > { %v1158_v48 = vpop.eup %1157 }
 0x5cf   : > { %v914_v49 = vadd.f32 %v1158_v48, %v913_v47 }
 0x5d1   : > { %915 = vst [vmem:[%s297_s25] sm:$0x1] %v914_v49 }
 0x5d2   : > { %1172 = shalt.err (!%p1169_p3)
}
 0x5d3   : > { %s1173_s20 = scalar_lea.hbm %s1450_s11, 16  ;;  %s1177_s23 = scalar_lea.hbm %s1500_s8, 32 }
 0x5d4   : > { %p1174_p4 = scmp.ne.s32.totalorder %s1450_s11, %s1173_s20  ;;  %p1178_p9 = scmp.lt.u32.totalorder %s1450_s11, %s1500_s8 }
 0x5d5   : > { %p1179_p10 = scmp.lt.u32.totalorder %s1177_s23, %s1173_s20  ;;  %p1181_p12 = scmp.lt.u32.totalorder %s1173_s20, %s1450_s11 }
 0x5d6   : > { %p1175_p7 = pnand %p1174_p4, %p1313_p5 }
 0x5d7   : > { %p1180_p11 = por %p1179_p10, %p1178_p9 }
 0x5d8   : > { %p1176_p8 = pneg %p1175_p7 }
 0x5d9   : > { %p1182_p13 = por %p1181_p12, %p1180_p11 }
 0x5db   : > { %p1183_p0 = pnand %p1182_p13, %p1176_p8 }
 0x5dd   : > { %1186 = shalt.err (!%p1183_p0)
}
 0x5de   : > { %1096 = dma.vmem_to_hbm [thread:$0]  (%p1313_p5), %s1452_s26, 16, %s1450_s11, %s917_s13  }
 0x5df PF: > { %p1102_p1 = scmp.ge.s32.totalorder %s1221_s10, 2  ;;  %s941_s27 = sand.u32 1, %s1209_s29  }
 0x5e0   : > { %s942_s28 = scalar_lea.sflag [#allocation4], %s941_s27 }
 0x5e1   : > { %p1099_p2 = pnand %p1102_p1, %p1317_p6 }
 0x5e3   : > { %1204 = dma.done.wait (!%p1099_p2), %s942_s28, 16  }
 0x5e4   : > { %1206 = vsyncadd (!%p1099_p2), %s942_s28, 4294967280  ;;  %p20_p3 = scmp.ge.s32.totalorder %s1300_s12, 4   ;;  %s1503_s29 = smov %s1213_s30 }
 0x5e5   : > { %s1504_s30 = smov %s1217_s9  ;;  %s1505_s9 = smov %s1311_s15 }
 0x5e6   : > { %s1506_s10 = smov %s1300_s12  ;;  %22 = sbr.rel (!%p20_p3) target bundleno = 6 (0x6), region = 96 }
 0x5ed   :  { %946 = vsyncpa [#allocation4], 1 }
 0x5ee   :  { %948 = vsyncpa [#allocation4 + $0x1], 1 }

</bundles_post_ra>
